<compile_context>
chip_gen: v6e
topology: v6e:2x2x1
jax: 0.10.0
libtpu: 0.0.40
codegen_flags: <defaults>
</compile_context>

<pallas_src>
import jax
import jax.numpy as jnp
from jax.experimental import pallas as pl
from jax.experimental.pallas import tpu as pltpu


def merge_stacked_kernel(q_ref, w_ref, b_ref, f_ref, o_ref):
    # q_ref: (TB, Dq), w_ref: (Dq, n), b_ref: (1, n),
    # f_ref: (TB, n, D), o_ref: (TB, D)
    q = q_ref[...].astype(jnp.float32)
    w = w_ref[...].astype(jnp.float32)
    b = b_ref[...].astype(jnp.float32)

    # Linear for the whole batch tile: one MXU pass (TB, Dq) @ (Dq, n).
    logits = jnp.dot(q, w, preferred_element_type=jnp.float32) + b  # (TB, n)

    # Row-wise softmax over n (numerically stable).
    m = jnp.max(logits, axis=-1, keepdims=True)
    e = jnp.exp(logits - m)
    denom = jnp.sum(e, axis=-1, keepdims=True)
    # approx=True -> EUP vrcp slot (otherwise idle here).
    alphas = e * pl.reciprocal(denom, approx=True)                  # (TB, n)

    # Weighted sum over the n stacked features on VPU + XLU:
    # broadcast-multiply along lanes (D) then reduce over sublanes (n).
    f = f_ref[...].astype(jnp.float32)                              # (TB, n, D)
    out = jnp.sum(alphas[:, :, None] * f, axis=1)                   # (TB, D)
    o_ref[...] = out.astype(o_ref.dtype)


def _choose_batch_tile(B, n, D, itemsize, max_tb=256,
                       vmem_budget_bytes=8 * 1024 * 1024):
    """Pick TB (multiple of 8) so the double-buffered feature tile fits VMEM."""
    per_row_bytes = max(1, 2 * n * D * itemsize)   # x2 for double buffering
    rows = vmem_budget_bytes // per_row_bytes
    rows = max(8, (rows // 8) * 8)
    tb = min(max_tb, rows)
    b_up8 = ((B + 7) // 8) * 8
    return max(8, min(tb, b_up8))


def merge_stacked(feature, query, W, b, *, block_b=256, vmem_limit_bytes=None):
    """feature: (B, n, D); query: (B, Dq); W: (Dq, n); b: (n,) -> (B, D)."""
    B, n, D = feature.shape
    Bq, Dq = query.shape
    assert Bq == B, (Bq, B)
    b2 = b.reshape(1, n)

    itemsize = jnp.dtype(feature.dtype).itemsize
    TB = _choose_batch_tile(B, n, D, itemsize, max_tb=block_b)

    # Pad the batch to a multiple of TB (padded rows are independent garbage
    # rows computed on zeros and sliced off below).
    B_pad = pl.cdiv(B, TB) * TB
    if B_pad != B:
        pad = B_pad - B
        feature_p = jnp.pad(feature, ((0, pad), (0, 0), (0, 0)))
        query_p = jnp.pad(query, ((0, pad), (0, 0)))
    else:
        feature_p, query_p = feature, query

    grid = (B_pad // TB,)

    out_padded = pl.pallas_call(
        merge_stacked_kernel,
        out_shape=jax.ShapeDtypeStruct((B_pad, D), feature.dtype),
        grid_spec=pltpu.PrefetchScalarGridSpec(
            num_scalar_prefetch=0,
            grid=grid,
            in_specs=[
                pl.BlockSpec((TB, Dq), lambda i: (i, 0)),       # query tile
                pl.BlockSpec((Dq, n), lambda i: (0, 0)),        # weight (grid-invariant)
                pl.BlockSpec((1, n), lambda i: (0, 0)),         # bias   (grid-invariant)
                pl.BlockSpec((TB, n, D), lambda i: (i, 0, 0)),  # feature slab
            ],
            out_specs=pl.BlockSpec((TB, D), lambda i: (i, 0)),  # lane-dense output slab
        ),
        compiler_params=pltpu.CompilerParams(
            dimension_semantics=("parallel",),
            vmem_limit_bytes=vmem_limit_bytes,
        ),
    )(query_p, W, b2, feature_p)

    return out_padded[:B] if B_pad != B else out_padded


def merge_stacked_ref(feature, query, W, b):
    logits = query @ W + b[None, :]
    alphas = jax.nn.softmax(logits, axis=-1)[:, None, :]    # (B, 1, n)
    return jnp.einsum("bon,bnd->bod", alphas, feature)[:, 0, :]


if __name__ == "__main__":
    # Small shapes consistent with the module's forward:
    B, n, Dq, D = 2, 8, 32, 16

    key = jax.random.PRNGKey(0)
    k_f, k_q, k_w, k_b = jax.random.split(key, 4)

    feature = jax.random.normal(k_f, (B, n, D), dtype=jnp.float32)
    query = jax.random.normal(k_q, (B, Dq), dtype=jnp.float32)
    # Deterministic Linear(query_dim=Dq, n) parameters (W stored transposed: (Dq, n)).
    W = jax.random.normal(k_w, (Dq, n), dtype=jnp.float32) * 0.05
    b = jax.random.normal(k_b, (n,), dtype=jnp.float32) * 0.05

    out = merge_stacked(feature, query, W, b)
    out = jax.block_until_ready(out)

    ref = merge_stacked_ref(feature, query, W, b)
    assert out.shape == (B, D), out.shape
    # Slightly loosened tolerance: softmax denominator uses the EUP
    # approximate reciprocal (pl.reciprocal(..., approx=True)).
    assert jnp.allclose(out, ref, atol=2e-3, rtol=2e-3), (
        float(jnp.max(jnp.abs(out - ref)))
    )

    print("KERNEL_OK")
</pallas_src>

<mosaic_0001>
module attributes {stable_mosaic.version = 11 : i64} {
  func.func @merge_stacked_kernel(%arg0: i32, %arg1: memref<8x32xf32, #tpu.memory_space<vmem>>, %arg2: memref<32x8xf32, #tpu.memory_space<vmem>>, %arg3: memref<1x8xf32, #tpu.memory_space<vmem>>, %arg4: memref<8x8x16xf32, #tpu.memory_space<vmem>>, %arg5: memref<8x16xf32, #tpu.memory_space<vmem>>) attributes {dimension_semantics = [#tpu.dimension_semantics<parallel>], iteration_bounds = array<i64: 1>, scalar_prefetch = 0 : i64, scratch_operands = 0 : i64, tpu.core_type = #tpu.core_type<tc>, window_params = [{transform_indices = @transform_0, window_bounds = array<i64: 8, 32>}, {pipeline_mode = #tpu.pipeline_mode<synchronous>, transform_indices = @transform_1, window_bounds = array<i64: 32, 8>}, {pipeline_mode = #tpu.pipeline_mode<synchronous>, transform_indices = @transform_2, window_bounds = array<i64: 1, 8>}, {transform_indices = @transform_3, window_bounds = array<i64: 8, 8, 16>}, {transform_indices = @transform_4, window_bounds = array<i64: 8, 16>}]} {
    %c0 = arith.constant 0 : index
    %c0_0 = arith.constant 0 : index
    %0 = vector.load %arg1[%c0, %c0_0] : memref<8x32xf32, #tpu.memory_space<vmem>>, vector<8x32xf32>
    %c0_1 = arith.constant 0 : index
    %c0_2 = arith.constant 0 : index
    %1 = vector.load %arg2[%c0_1, %c0_2] : memref<32x8xf32, #tpu.memory_space<vmem>>, vector<32x8xf32>
    %c0_3 = arith.constant 0 : index
    %c0_4 = arith.constant 0 : index
    %2 = vector.load %arg3[%c0_3, %c0_4] : memref<1x8xf32, #tpu.memory_space<vmem>>, vector<1x8xf32>
    %cst = arith.constant dense<0.000000e+00> : vector<8x8xf32>
    %3 = tpu.matmul %0, %1, %cst {dimension_numbers = #tpu.dot_dimension_numbers<[1], [0], [0], [1], [0, 0, 1, 1], [], []>} : vector<8x32xf32>, vector<32x8xf32>, vector<8x8xf32> -> vector<8x8xf32>
    %4 = vector.broadcast %2 : vector<1x8xf32> to vector<8x8xf32>
    %5 = arith.addf %3, %4 : vector<8x8xf32>
    %cst_5 = arith.constant dense<0xFF800000> : vector<8xf32>
    %6 = vector.multi_reduction <maximumf>, %5, %cst_5 [1] : vector<8x8xf32> to vector<8xf32>
    %7 = vector.shape_cast %6 : vector<8xf32> to vector<8x1xf32>
    %8 = vector.broadcast %7 : vector<8x1xf32> to vector<8x8xf32>
    %9 = arith.subf %5, %8 : vector<8x8xf32>
    %10 = math.exp %9 : vector<8x8xf32>
    %cst_6 = arith.constant dense<0.000000e+00> : vector<8xf32>
    %11 = vector.multi_reduction <add>, %10, %cst_6 [1] : vector<8x8xf32> to vector<8xf32>
    %12 = vector.shape_cast %11 : vector<8xf32> to vector<8x1xf32>
    %13 = tpu.reciprocal %12 {approx = true} : vector<8x1xf32> -> vector<8x1xf32>
    %14 = vector.broadcast %13 : vector<8x1xf32> to vector<8x8xf32>
    %15 = arith.mulf %10, %14 : vector<8x8xf32>
    %c0_7 = arith.constant 0 : index
    %c0_8 = arith.constant 0 : index
    %c0_9 = arith.constant 0 : index
    %16 = vector.load %arg4[%c0_7, %c0_8, %c0_9] : memref<8x8x16xf32, #tpu.memory_space<vmem>>, vector<8x8x16xf32>
    %17 = vector.shape_cast %15 : vector<8x8xf32> to vector<8x8x1xf32>
    %18 = vector.broadcast %17 : vector<8x8x1xf32> to vector<8x8x16xf32>
    %19 = arith.mulf %18, %16 : vector<8x8x16xf32>
    %cst_10 = arith.constant dense<0.000000e+00> : vector<8x16xf32>
    %20 = vector.multi_reduction <add>, %19, %cst_10 [1] : vector<8x8x16xf32> to vector<8x16xf32>
    %c0_11 = arith.constant 0 : index
    %c0_12 = arith.constant 0 : index
    %21 = vector.load %arg5[%c0_11, %c0_12] : memref<8x16xf32, #tpu.memory_space<vmem>>, vector<8x16xf32>
    tpu.vector_store %arg5[%c0_11, %c0_12], %20 {strides = array<i32>} : memref<8x16xf32, #tpu.memory_space<vmem>>, vector<8x16xf32>,
    return
  }
  func.func @transform_0(%arg0: i32) -> (i32, i32) {
    %c0_i32 = arith.constant 0 : i32
    %c0_i32_0 = arith.constant 0 : i32
    return %arg0, %c0_i32 : i32, i32
  }
  func.func @transform_1(%arg0: i32) -> (i32, i32) {
    %c0_i32 = arith.constant 0 : i32
    %c0_i32_0 = arith.constant 0 : i32
    %c0_i32_1 = arith.constant 0 : i32
    return %c0_i32, %c0_i32_0 : i32, i32
  }
  func.func @transform_2(%arg0: i32) -> (i32, i32) {
    %c0_i32 = arith.constant 0 : i32
    %c0_i32_0 = arith.constant 0 : i32
    %c0_i32_1 = arith.constant 0 : i32
    return %c0_i32, %c0_i32_0 : i32, i32
  }
  func.func @transform_3(%arg0: i32) -> (i32, i32, i32) {
    %c0_i32 = arith.constant 0 : i32
    %c0_i32_0 = arith.constant 0 : i32
    %c0_i32_1 = arith.constant 0 : i32
    return %arg0, %c0_i32, %c0_i32_0 : i32, i32, i32
  }
  func.func @transform_4(%arg0: i32) -> (i32, i32) {
    %c0_i32 = arith.constant 0 : i32
    %c0_i32_0 = arith.constant 0 : i32
    return %arg0, %c0_i32 : i32, i32
  }
}

</mosaic_0001>

<bundles_post_ra>
// kernel: tpu_custom_call.1
= control target key start
LH: loop header
LB: loop body
LE: loop exit
PB: predicated region body
PF: predicated region fallthrough
CT: control target
= control target key end

     0   :  { %9 = vsyncpa [#allocation3], 0  ;;  %s434_s0 = inlined_call_operand.vmem [shape: f32[8,32], index: 0, kind: input, shape index: {}]   ;;  %s435_s1 = inlined_call_operand.vmem [shape: f32[32,8], index: 1, kind: input, shape index: {}]   ;;  %s436_s2 = inlined_call_operand.vmem [shape: f32[1,8], index: 2, kind: input, shape index: {}]   ;;  %s437_s3 = inlined_call_operand.hbm [shape: f32[8,8,16], index: 3, kind: input, shape index: {}]   ;;  %s438_s4 = inlined_call_operand.hbm [shape: f32[8,16], index: 4, kind: output, shape index: {}]  }
   0x1   :  { %10 = vsyncpa [#allocation4], 0  ;;  %s370_s15 = smov [#allocation2]  }
   0x2   :  { %s22_s16 = sshll.u32 %s370_s15, 4  ;;  %s23_s16 = int_to_ptr.vmem [resolvable:$true] %s22_s16 }
   0x3   :  { %s334_s17 = scalar_lea.vmem %s23_s16, 1024  ;;  %p339_p1 = scmp.lt.s32.totalorder %s23_s16, %s23_s16 }
   0x4   :  { %p335_p0 = scmp.ne.s32.totalorder %s23_s16, %s334_s17  ;;  %p340_p2 = scmp.lt.s32.totalorder %s334_s17, %s334_s17 }
   0x6   :  { %p341_p3 = por %p340_p2, %p339_p1 }
   0x8   :  { %p342_p4 = pnand %p341_p3, %p335_p0 }
   0xa   :  { %345 = shalt.err (!%p342_p4)
}
   0xb   :  { %s371_s18 = smov 128   ;;  %s372_s19 = smov 8  }
   0xc   :  { %28 = dma.hbm_to_vmem [thread:$0]  %s437_s3, 1024, %s23_s16, [#allocation3], %s371_s18, %s371_s18, %s372_s19  }
   0xd   :  { %366 = dma.done.wait [#allocation3], 1024  }
   0xe   :  { %367 = vsyncadd [#allocation3], 4294966272  ;;  %v373_v0 = vmov 0.0   ;;  %vm374_vm0 = vmmov 0   ;;  %v36_v1 = vld [vmem:[%s435_s1 + $0x18] sm:$0xff]  ;;  %v35_v2 = vld [vmem:[%s435_s1 + $0x10] sm:$0xff]  ;;  %v138_v17 = vlaneseq }
   0xf   :  { %305 = vmatprep.subr.mxu0 %v373_v0  ;;  %313 = vmatprep.mubr.msk.f32.mxu0 %vm374_vm0, %v373_v0  ;;  %v34_v3 = vld [vmem:[%s435_s1 + $0x8] sm:$0xff]  ;;  %v33_v4 = vld [vmem:[%s435_s1] sm:$0xff]  ;;  %vm44_vm1 = vcmask 261120   ;;  %vm118_vm2 = vcmask 64512   ;;  %v132_v40 = vld [vmem:[#allocation2 + $0x10] sm:$0xff]  ;;  %vm202_vm3 = vcmask 130048  }
  0x10   :  { %306 = vmatpush3.msra.mxu0 %v36_v1  ;;  %v32_v5 = vld [vmem:[%s434_s0] sm:$0xff]  ;;  %v139_v18 = vshrl.u32 %v138_v17, 7  ;;  %v131_v39 = vld [vmem:[#allocation2 + $0x8] sm:$0xff]  ;;  %v133_v46 = vld [vmem:[#allocation2 + $0x18] sm:$0xff]  ;;  %vm267_vm4 = vcmask 1041409   ;;  %vm269_vm5 = vcmask 1042434  }
  0x11   :  { %307 = vmatprep.subr.mxu0 %v373_v0  ;;  %v298_v6 = vld [vmem:[%s436_s2] ss:$0 sm:$0xff]  ;;  %v135_v62 = vld [vmem:[#allocation2 + $0x28] sm:$0xff]  ;;  %vm271_vm6 = vcmask 1043459   ;;  %vm273_vm7 = vcmask 1044484   ;;  %vm275_vm8 = vcmask 1045509  }
  0x12   :  { %308 = vmatpush3.msra.mxu0 %v35_v2  ;;  %v154_v19 = vsub.s32 2, %v139_v18  ;;  %v140_v20 = vsub.s32 0, %v139_v18  ;;  %v147_v25 = vsub.s32 1, %v139_v18  ;;  %v161_v27 = vsub.s32 3, %v139_v18  ;;  %v130_v37 = vld [vmem:[#allocation2] sm:$0xff]  ;;  %s375_s0 = smov [#allocation5]  }
  0x13   :  { %309 = vmatprep.subr.mxu0 %v373_v0  ;;  %v168_v29 = vsub.s32 4, %v139_v18  ;;  %v175_v31 = vsub.s32 5, %v139_v18  ;;  %v182_v33 = vsub.s32 6, %v139_v18  ;;  %v189_v35 = vsub.s32 7, %v139_v18  ;;  %v134_v54 = vld [vmem:[#allocation2 + $0x20] sm:$0xff]  ;;  %s289_s1 = sshll.u32 %s375_s0, 4  ;;  %s290_s1 = int_to_ptr.vmem [resolvable:$true] %s289_s1 }
  0x14   :  { %310 = vmatpush3.msra.mxu0 %v34_v3  ;;  %vm277_vm9 = vcmask 1046534   ;;  %vm279_vm10 = vcmask 1047559   ;;  %s346_s2 = scalar_lea.vmem %s290_s1, 128  ;;  %p351_p6 = scmp.lt.s32.totalorder %s290_s1, %s290_s1 }
  0x15   :  { %311 = vmatprep.subr.mxu0 %v373_v0  ;;  %p347_p5 = scmp.ne.s32.totalorder %s290_s1, %s346_s2  ;;  %p352_p7 = scmp.lt.s32.totalorder %s346_s2, %s346_s2 }
  0x16   :  { %312 = vmatpush3.msra.mxu0 %v33_v4 }
  0x17   :  { %314 = vmatmul.mubr.msk.f32.vlgmr.msra.gmra.mxu0 %vm44_vm1, %v32_v5  ;;  %p353_p8 = por %p352_p7, %p351_p6 }
  0x19   :  { %p354_p9 = pnand %p353_p8, %p347_p5 }
  0xd7   :  { %v114_v7 = vpop.f32.mrf.mxu0 }
  0xd8   :  { %v115_v8 = vadd.f32 %v298_v6, %v114_v7 }
  0xd9   :  { %v315_v9 = vpop.f32.mrf.mxu0 }
  0xda   :  { %v119_v10 = vsel %vm118_vm2, %v115_v8, -inf }
  0xdb   :  { %120 = vmax.xlane.f32.xlu0 %v119_v10 }
 0x164   :  { %v121_v11 = vpop.xlane.xlu0 %120 }
 0x165   :  { %v122_v12 = vsub.f32 %v115_v8, %v121_v11  ;;  %v136_v8 = vld [vmem:[#allocation2 + $0x30] sm:$0xff] }
 0x167   :  { %v123_v13 = vmul.f32 1.442695, %v122_v12 }
 0x169   :  { %322 = vpow2.f32 %v123_v13 }
 0x176   :  { %v323_v14 = vpop.eup %322 }
 0x177   :  { %v125_v15 = vsel %vm118_vm2, %v323_v14, 0.0 }
 0x178   :  { %126 = vadd.xlane.f32.xlu0 %v125_v15 }
 0x201   :  { %v127_v16 = vpop.xlane.xlu0 %126 }
 0x202   :  { %324 = vrcp.f32 %v127_v16 }
 0x20f   :  { %v325_v21 = vpop.eup %324 }
 0x210   :  { %v129_v22 = vmul.f32 %v325_v21, %v323_v14 }
 0x212   :  { %v155_v23 = vrot.slane %v129_v22, %v154_v19  ;;  %v141_v24 = vrot.slane %v129_v22, %v140_v20  ;;  %v148_v26 = vrot.slane %v129_v22, %v147_v25  ;;  %v162_v28 = vrot.slane %v129_v22, %v161_v27  ;;  %v137_v19 = vld [vmem:[#allocation2 + $0x38] sm:$0xff] }
 0x213   :  { %v169_v30 = vrot.slane %v129_v22, %v168_v29  ;;  %v176_v32 = vrot.slane %v129_v22, %v175_v31  ;;  %v183_v34 = vrot.slane %v129_v22, %v182_v33  ;;  %v190_v36 = vrot.slane %v129_v22, %v189_v35 }
 0x214   :  { %157 = vbcast.lane.b32.xlu0 %v155_v23, 256  ;;  %143 = vbcast.lane.b32.xlu1 %v141_v24, 256 }
 0x218   :  { %150 = vbcast.lane.b32.xlu1 %v148_v26, 256 }
 0x21c   :  { %164 = vbcast.lane.b32.xlu1 %v162_v28, 256 }
 0x220   :  { %171 = vbcast.lane.b32.xlu1 %v169_v30, 256 }
 0x224   :  { %178 = vbcast.lane.b32.xlu1 %v176_v32, 256 }
 0x228   :  { %185 = vbcast.lane.b32.xlu1 %v183_v34, 256 }
 0x22c   :  { %192 = vbcast.lane.b32.xlu1 %v190_v36, 256 }
 0x286   :  { %v144_v38 = vpop.permute.xlu1 %143  ;;  %v158_v41 = vpop.permute.xlu0 %157 }
 0x287   :  { %v194_v42 = vmul.f32 %v144_v38, %v130_v37  ;;  %v196_v45 = vmul.f32 %v158_v41, %v132_v40 }
 0x289   :  { %v203_v47 = vsel %vm202_vm3, %v194_v42, 0.0  ;;  %v217_v52 = vsel %vm202_vm3, %v196_v45, 0.0 }
 0x28a   :  { %v151_v43 = vpop.permute.xlu1 %150  ;;  %v204_v53 = vrot.slane %v203_v47, 4  ;;  %v218_v59 = vrot.slane %v217_v52, 4 }
 0x28b   :  { %v195_v44 = vmul.f32 %v151_v43, %v131_v39 }
 0x28c   :  { %v205_v61 = vadd.f32 %v204_v53, %v203_v47  ;;  %v219_v4 = vadd.f32 %v218_v59, %v217_v52 }
 0x28d   :  { %v210_v48 = vsel %vm202_vm3, %v195_v44, 0.0 }
 0x28e   :  { %v211_v49 = vrot.slane %v210_v48, 4  ;;  %v165_v50 = vpop.permute.xlu1 %164  ;;  %v206_v6 = vrot.slane %v205_v61, 2  ;;  %v220_v14 = vrot.slane %v219_v4, 2 }
 0x28f   :  { %v197_v51 = vmul.f32 %v165_v50, %v133_v46 }
 0x290   :  { %v212_v56 = vadd.f32 %v211_v49, %v210_v48  ;;  %v207_v17 = vadd.f32 %v206_v6, %v205_v61  ;;  %v221_v26 = vadd.f32 %v220_v14, %v219_v4 }
 0x291   :  { %v224_v55 = vsel %vm202_vm3, %v197_v51, 0.0 }
 0x292   :  { %v225_v57 = vrot.slane %v224_v55, 4  ;;  %v172_v58 = vpop.permute.xlu1 %171  ;;  %v213_v0 = vrot.slane %v212_v56, 2  ;;  %v208_v29 = vrot.slane %v207_v17, 1  ;;  %v222_v37 = vrot.slane %v221_v26, 1 }
 0x293   :  { %v198_v60 = vmul.f32 %v172_v58, %v134_v54 }
 0x294   :  { %v226_v1 = vadd.f32 %v225_v57, %v224_v55  ;;  %v214_v10 = vadd.f32 %v213_v0, %v212_v56  ;;  %v209_v39 = vadd.f32 %v208_v29, %v207_v17  ;;  %v223_v47 = vadd.f32 %v222_v37, %v221_v26 }
 0x295   :  { %v231_v63 = vsel %vm202_vm3, %v198_v60, 0.0 }
 0x296   :  { %v232_v2 = vrot.slane %v231_v63, 4  ;;  %v179_v3 = vpop.permute.xlu1 %178  ;;  %v227_v11 = vrot.slane %v226_v1, 2  ;;  %v215_v21 = vrot.slane %v214_v10, 1 }
 0x297   :  { %v199_v5 = vmul.f32 %v179_v3, %v135_v62 }
 0x298   :  { %v233_v7 = vadd.f32 %v232_v2, %v231_v63  ;;  %v228_v22 = vadd.f32 %v227_v11, %v226_v1  ;;  %v216_v33 = vadd.f32 %v215_v21, %v214_v10 }
 0x299   :  { %v238_v9 = vsel %vm202_vm3, %v199_v5, 0.0 }
 0x29a   :  { %v239_v12 = vrot.slane %v238_v9, 4  ;;  %v186_v13 = vpop.permute.xlu1 %185  ;;  %v234_v15 = vrot.slane %v233_v7, 2  ;;  %v229_v34 = vrot.slane %v228_v22, 1  ;;  %v268_v43 = vsel %vm267_vm4, %v216_v33, %v209_v39 }
 0x29b   :  { %v200_v16 = vmul.f32 %v186_v13, %v136_v8  ;;  %v270_v51 = vsel %vm269_vm5, %v223_v47, %v268_v43 }
 0x29c   :  { %v240_v18 = vadd.f32 %v239_v12, %v238_v9  ;;  %v235_v27 = vadd.f32 %v234_v15, %v233_v7  ;;  %v230_v44 = vadd.f32 %v229_v34, %v228_v22 }
 0x29d   :  { %v245_v20 = vsel %vm202_vm3, %v200_v16, 0.0 }
 0x29e   :  { %v241_v23 = vrot.slane %v240_v18, 2  ;;  %v246_v24 = vrot.slane %v245_v20, 4  ;;  %v193_v25 = vpop.permute.xlu1 %192  ;;  %v236_v38 = vrot.slane %v235_v27, 1  ;;  %v272_v53 = vsel %vm271_vm6, %v230_v44, %v270_v51 }
 0x29f   :  { %v201_v28 = vmul.f32 %v193_v25, %v137_v19 }
 0x2a0   :  { %v242_v30 = vadd.f32 %v241_v23, %v240_v18  ;;  %v247_v31 = vadd.f32 %v246_v24, %v245_v20  ;;  %v237_v48 = vadd.f32 %v236_v38, %v235_v27 }
 0x2a1   :  { %v252_v32 = vsel %vm202_vm3, %v201_v28, 0.0 }
 0x2a2   :  { %v248_v35 = vrot.slane %v247_v31, 2  ;;  %v253_v36 = vrot.slane %v252_v32, 4  ;;  %v243_v40 = vrot.slane %v242_v30, 1  ;;  %v274_v55 = vsel %vm273_vm7, %v237_v48, %v272_v53 }
 0x2a4   :  { %v249_v41 = vadd.f32 %v248_v35, %v247_v31  ;;  %v254_v42 = vadd.f32 %v253_v36, %v252_v32  ;;  %v244_v49 = vadd.f32 %v243_v40, %v242_v30 }
 0x2a6   :  { %v250_v45 = vrot.slane %v249_v41, 1  ;;  %v255_v46 = vrot.slane %v254_v42, 2  ;;  %v276_v57 = vsel %vm275_vm8, %v244_v49, %v274_v55 }
 0x2a8   :  { %v256_v50 = vadd.f32 %v255_v46, %v254_v42  ;;  %v251_v52 = vadd.f32 %v250_v45, %v249_v41 }
 0x2aa   :  { %v257_v54 = vrot.slane %v256_v50, 1  ;;  %v278_v58 = vsel %vm277_vm9, %v251_v52, %v276_v57 }
 0x2ac   :  { %v258_v56 = vadd.f32 %v257_v54, %v256_v50 }
 0x2ae   :  { %v280_v59 = vsel %vm279_vm10, %v258_v56, %v278_v58 }
 0x2af   :  { %282 = vst.msk [vmem:[#allocation5] sm:$0xff] %vm202_vm3, %v280_v59 }
 0x2b0   :  { %357 = shalt.err (!%p354_p9)
}
 0x2b1   :  { %292 = dma.vmem_to_hbm [thread:$0]  %s290_s1, 128, %s438_s4, [#allocation4]  }
 0x2b2   :  { %368 = dma.done.wait [#allocation4], 128  }
 0x2b3   :  { %369 = vsyncadd [#allocation4], 4294967168 }
 0x2b4   :  { %296 = vsyncpa [#allocation3], 1 }
 0x2b5   :  { %297 = vsyncpa [#allocation4], 1 }

</bundles_post_ra>
